<compile_context>
chip_gen: v6e
topology: v6e:2x2x1
jax: 0.10.0
libtpu: 0.0.40
codegen_flags: <defaults>
</compile_context>

<pallas_src>
import jax
import jax.numpy as jnp
from jax.experimental import pallas as pl
from jax.experimental.pallas import tpu as pltpu


def wordnet_kernel(x_ref, w1_ref, b1_ref, w2_ref, b2_ref, o_ref):
    # x_ref:  (TB, size)   streamed batch tile (f32 or bf16)
    # w1_ref: (size, n)    resident fc1 weight (same dtype as x)
    # b1_ref: (1, n)       fc1 bias (f32)
    # w2_ref: (1, n)       fc2 weight row (f32)
    # b2_ref: (1, 1)       fc2 bias scalar (SMEM, f32)
    # o_ref:  (1, 1, TB)   lane-dense output tile (batch along lanes)

    # fc1 + ReLU — the only MXU pass; accumulate in f32.
    h = jnp.dot(x_ref[...], w1_ref[...], preferred_element_type=jnp.float32)
    h = jnp.maximum(h + b1_ref[...], 0.0)                      # (TB, n) f32

    # fc2 (out_features == 1): VPU mul + cross-lane reduce, b2 from SMEM.
    z = jnp.sum(h * w2_ref[...], axis=-1) + b2_ref[0, 0]       # (TB,) f32

    # sigmoid via EUP exp + approximate reciprocal.
    p = pl.reciprocal(1.0 + jnp.exp(-z), approx=True)

    # Lane-dense store: batch lives on the lane axis of the output block.
    o_ref[...] = p.reshape(o_ref.shape).astype(o_ref.dtype)


def wordnet_forward(x, w1, b1, w2, b2, *, tile_b=512, input_dtype=None):
    """WordNet forward pass.

    x:  (B, size)
    w1: (size, n)   fc1 weight, pre-transposed vs PyTorch fc1.weight
    b1: (1, n)
    w2: (1, n)      fc2 weight (natural PyTorch fc2.weight layout)
    b2: (1, 1)
    tile_b:         batch tile (rounded down to a multiple of 128, min 128)
    input_dtype:    e.g. jnp.bfloat16 to halve HBM traffic for x / W1;
                    all post-matmul math stays f32.
    """
    B, size = x.shape
    n = w1.shape[1]

    if input_dtype is not None:
        x = x.astype(input_dtype)
        w1 = w1.astype(input_dtype)
    b1 = b1.astype(jnp.float32)
    w2 = w2.astype(jnp.float32)
    b2 = b2.astype(jnp.float32)

    # Lane-dense batch tiling: pad B up to a whole number of tiles.
    tile_b = max(128, (int(tile_b) // 128) * 128)
    num_tiles = pl.cdiv(B, tile_b)
    b_pad = num_tiles * tile_b
    if b_pad != B:
        x = jnp.pad(x, ((0, b_pad - B), (0, 0)))

    out = pl.pallas_call(
        wordnet_kernel,
        out_shape=jax.ShapeDtypeStruct((num_tiles, 1, tile_b), jnp.float32),
        grid=(num_tiles,),
        in_specs=[
            pl.BlockSpec((tile_b, size), lambda i: (i, 0)),      # x: streamed tile
            pl.BlockSpec((size, n), lambda i: (0, 0)),           # W1: resident
            pl.BlockSpec((1, n), lambda i: (0, 0)),              # b1
            pl.BlockSpec((1, n), lambda i: (0, 0)),              # W2 row
            pl.BlockSpec(memory_space=pltpu.MemorySpace.SMEM),   # b2 scalar
        ],
        out_specs=pl.BlockSpec((1, 1, tile_b), lambda i: (i, 0, 0)),
        compiler_params=pltpu.CompilerParams(
            dimension_semantics=("parallel",),
            vmem_limit_bytes=32 * 1024 * 1024,
        ),
    )(x, w1, b1, w2, b2)

    # (num_tiles, 1, tile_b) -> (B, 1); batch index = tile * tile_b + lane.
    return out.reshape(b_pad, 1)[:B]


if __name__ == "__main__":
    # Small shapes consistent with the module (size=32, n=32); B=200 exercises
    # batch padding (200 -> 256) and a 2-step parallel grid (v7x: both TCs busy).
    B, SIZE, N = 200, 32, 32

    key = jax.random.PRNGKey(0)
    kx, kw1, kb1, kw2, kb2 = jax.random.split(key, 5)

    x = jax.random.normal(kx, (B, SIZE), dtype=jnp.float32)
    # Deterministic parameter init (Kaiming-uniform-ish scale, like nn.Linear)
    w1 = jax.random.uniform(kw1, (SIZE, N), jnp.float32, -1.0, 1.0) / jnp.sqrt(SIZE)
    b1 = jax.random.uniform(kb1, (1, N), jnp.float32, -1.0, 1.0) / jnp.sqrt(SIZE)
    w2 = jax.random.uniform(kw2, (1, N), jnp.float32, -1.0, 1.0) / jnp.sqrt(N)
    b2 = jax.random.uniform(kb2, (1, 1), jnp.float32, -1.0, 1.0) / jnp.sqrt(N)

    def reference(xr, w1r):
        h = jnp.maximum(xr @ w1r + b1, 0.0)
        return jax.nn.sigmoid(h @ w2.T + b2)

    # f32 path
    out = jax.block_until_ready(wordnet_forward(x, w1, b1, w2, b2, tile_b=128))
    ref = reference(x, w1)
    assert out.shape == (B, 1)
    assert jnp.allclose(out, ref, atol=2e-3, rtol=2e-3)

    # bf16-input path (halved HBM traffic); compare against a reference that
    # sees the same bf16-rounded x / W1.
    out_bf = jax.block_until_ready(
        wordnet_forward(x, w1, b1, w2, b2, tile_b=128, input_dtype=jnp.bfloat16)
    )
    ref_bf = reference(
        x.astype(jnp.bfloat16).astype(jnp.float32),
        w1.astype(jnp.bfloat16).astype(jnp.float32),
    )
    assert jnp.allclose(out_bf, ref_bf, atol=2e-3, rtol=2e-3)

    print("KERNEL_OK")
</pallas_src>

<mosaic_0001>
module attributes {stable_mosaic.version = 11 : i64} {
  func.func @wordnet_kernel(%arg0: i32, %arg1: memref<128x32xf32, #tpu.memory_space<vmem>>, %arg2: memref<32x32xf32, #tpu.memory_space<vmem>>, %arg3: memref<1x32xf32, #tpu.memory_space<vmem>>, %arg4: memref<1x32xf32, #tpu.memory_space<vmem>>, %arg5: memref<1x1xf32, #tpu.memory_space<smem>>, %arg6: memref<1x1x128xf32, #tpu.memory_space<vmem>>) attributes {dimension_semantics = [#tpu.dimension_semantics<parallel>], iteration_bounds = array<i64: 2>, scalar_prefetch = 0 : i64, scratch_operands = 0 : i64, tpu.core_type = #tpu.core_type<tc>, window_params = [{transform_indices = @transform_0, window_bounds = array<i64: 128, 32>}, {pipeline_mode = #tpu.pipeline_mode<synchronous>, transform_indices = @transform_1, window_bounds = array<i64: 32, 32>}, {pipeline_mode = #tpu.pipeline_mode<synchronous>, transform_indices = @transform_2, window_bounds = array<i64: 1, 32>}, {pipeline_mode = #tpu.pipeline_mode<synchronous>, transform_indices = @transform_3, window_bounds = array<i64: 1, 32>}, {transform_indices = @transform_4, window_bounds = array<i64: 1, 1>}, {transform_indices = @transform_5, window_bounds = array<i64: 1, 1, 128>}]} {
    %c0 = arith.constant 0 : index
    %c0_0 = arith.constant 0 : index
    %0 = vector.load %arg1[%c0, %c0_0] : memref<128x32xf32, #tpu.memory_space<vmem>>, vector<128x32xf32>
    %c0_1 = arith.constant 0 : index
    %c0_2 = arith.constant 0 : index
    %1 = vector.load %arg2[%c0_1, %c0_2] : memref<32x32xf32, #tpu.memory_space<vmem>>, vector<32x32xf32>
    %cst = arith.constant dense<0.000000e+00> : vector<128x32xf32>
    %2 = tpu.matmul %0, %1, %cst {dimension_numbers = #tpu.dot_dimension_numbers<[1], [0], [0], [1], [0, 0, 1, 1], [], []>} : vector<128x32xf32>, vector<32x32xf32>, vector<128x32xf32> -> vector<128x32xf32>
    %c0_3 = arith.constant 0 : index
    %c0_4 = arith.constant 0 : index
    %3 = vector.load %arg3[%c0_3, %c0_4] : memref<1x32xf32, #tpu.memory_space<vmem>>, vector<1x32xf32>
    %4 = vector.broadcast %3 : vector<1x32xf32> to vector<128x32xf32>
    %5 = arith.addf %2, %4 : vector<128x32xf32>
    %cst_5 = arith.constant 0.000000e+00 : f32
    %6 = vector.broadcast %cst_5 : f32 to vector<128x32xf32>
    %7 = arith.maximumf %5, %6 : vector<128x32xf32>
    %c0_6 = arith.constant 0 : index
    %c0_7 = arith.constant 0 : index
    %8 = vector.load %arg4[%c0_6, %c0_7] : memref<1x32xf32, #tpu.memory_space<vmem>>, vector<1x32xf32>
    %9 = vector.broadcast %8 : vector<1x32xf32> to vector<128x32xf32>
    %10 = arith.mulf %7, %9 : vector<128x32xf32>
    %cst_8 = arith.constant dense<0.000000e+00> : vector<128xf32>
    %11 = vector.multi_reduction <add>, %10, %cst_8 [1] : vector<128x32xf32> to vector<128xf32>
    %c0_9 = arith.constant 0 : index
    %c0_10 = arith.constant 0 : index
    %12 = memref.load %arg5[%c0_9, %c0_10] : memref<1x1xf32, #tpu.memory_space<smem>>
    %13 = vector.broadcast %12 : f32 to vector<128xf32>
    %14 = arith.addf %11, %13 : vector<128xf32>
    %cst_11 = arith.constant 0.000000e+00 : f32
    %15 = vector.broadcast %cst_11 : f32 to vector<128xf32>
    %16 = arith.subf %15, %14 : vector<128xf32>
    %17 = math.exp %16 : vector<128xf32>
    %cst_12 = arith.constant 1.000000e+00 : f32
    %18 = vector.broadcast %cst_12 : f32 to vector<128xf32>
    %19 = arith.addf %18, %17 : vector<128xf32>
    %20 = tpu.reciprocal %19 {approx = true} : vector<128xf32> -> vector<128xf32>
    %21 = vector.shape_cast %20 : vector<128xf32> to vector<1x1x128xf32>
    %c0_13 = arith.constant 0 : index
    %c0_14 = arith.constant 0 : index
    %c0_15 = arith.constant 0 : index
    %22 = vector.load %arg6[%c0_13, %c0_14, %c0_15] : memref<1x1x128xf32, #tpu.memory_space<vmem>>, vector<1x1x128xf32>
    tpu.vector_store %arg6[%c0_13, %c0_14, %c0_15], %21 {strides = array<i32>} : memref<1x1x128xf32, #tpu.memory_space<vmem>>, vector<1x1x128xf32>,
    return
  }
  func.func @transform_0(%arg0: i32) -> (i32, i32) {
    %c0_i32 = arith.constant 0 : i32
    %c0_i32_0 = arith.constant 0 : i32
    return %arg0, %c0_i32 : i32, i32
  }
  func.func @transform_1(%arg0: i32) -> (i32, i32) {
    %c0_i32 = arith.constant 0 : i32
    %c0_i32_0 = arith.constant 0 : i32
    %c0_i32_1 = arith.constant 0 : i32
    return %c0_i32, %c0_i32_0 : i32, i32
  }
  func.func @transform_2(%arg0: i32) -> (i32, i32) {
    %c0_i32 = arith.constant 0 : i32
    %c0_i32_0 = arith.constant 0 : i32
    %c0_i32_1 = arith.constant 0 : i32
    return %c0_i32, %c0_i32_0 : i32, i32
  }
  func.func @transform_3(%arg0: i32) -> (i32, i32) {
    %c0_i32 = arith.constant 0 : i32
    %c0_i32_0 = arith.constant 0 : i32
    %c0_i32_1 = arith.constant 0 : i32
    return %c0_i32, %c0_i32_0 : i32, i32
  }
  func.func @transform_4(%arg0: i32) -> (i32, i32) {
    %c0_i32 = arith.constant 0 : i32
    %c0_i32_0 = arith.constant 0 : i32
    %c0_i32_1 = arith.constant 0 : i32
    return %c0_i32, %c0_i32_0 : i32, i32
  }
  func.func @transform_5(%arg0: i32) -> (i32, i32, i32) {
    %c0_i32 = arith.constant 0 : i32
    %c0_i32_0 = arith.constant 0 : i32
    %c0_i32_1 = arith.constant 0 : i32
    return %arg0, %c0_i32, %c0_i32_0 : i32, i32, i32
  }
}

</mosaic_0001>

<bundles_post_ra>
// kernel: tpu_custom_call.1
= control target key start
LH: loop header
LB: loop body
LE: loop exit
PB: predicated region body
PF: predicated region fallthrough
CT: control target
= control target key end

     0   :  { %s1369_s0 = inlined_call_operand.vmem [shape: f32[256,32], index: 0, kind: input, shape index: {}]   ;;  %s1370_s1 = inlined_call_operand.vmem [shape: f32[32,32], index: 1, kind: input, shape index: {}]   ;;  %s1371_s2 = inlined_call_operand.vmem [shape: f32[1,32], index: 2, kind: input, shape index: {}]   ;;  %s1372_s3 = inlined_call_operand.vmem [shape: f32[1,32], index: 3, kind: input, shape index: {}]   ;;  %s1373_s4 = inlined_call_operand.<no memory space> [shape: f32[1,1], index: 4, kind: input, shape index: {}]   ;;  %s1374_s5 = inlined_call_operand.hbm [shape: f32[2,1,128], index: 5, kind: output, shape index: {}]  }
   0x1   :  { %10 = sst [smem:[#allocation2]] %s1373_s4 }
   0x2   :  { %11 = vsyncpa [#allocation4], 0 }
   0x3   :  { %13 = vsyncpa [#allocation4 + $0x1], 0  ;;  %s1114_s20 = smov 0   ;;  %s1116_s21 = smov 0  }
   0x4   :  { %s1118_s22 = smov 0   ;;  %s1120_s23 = smov 0  }
   0x5 LB: > { %s827_s4 = sadd.s32 4294967295, %s1078_s23   ;;  %s828_s24 = sadd.s32 4294967294, %s1078_s23   ;;  %s1078_s23 = sphi %s1120_s23, %s1380_s23   ;;  %s1074_s22 = sphi %s1118_s22, %s1379_s22   ;;  %s1070_s21 = sphi %s1116_s21, %s1378_s21   ;;  %s1066_s20 = sphi %s1114_s20, %s1377_s20  }
   0x6   : > { %s1137_s25 = sadd.s32 1, %s1078_s23   ;;  %s136_s26 = sadd.s32 1, %s1074_s22 }
   0x7   : > { %s133_s27 = ssub.s32 %s1078_s23, %s1137_s25  ;;  %p146_p0 = scmp.ne.s32.totalorder %s1074_s22, %s1070_s21 }
   0x8   : > { %p134_p1 = scmp.eq.s32.totalorder %s133_s27, 0  ;;  %p147_p2 = scmp.eq.s32.totalorder %s827_s4, 1 }
   0x9   : > { %p152_p3 = scmp.ne.s32.totalorder %s1070_s21, %s1066_s20  ;;  %p153_p4 = scmp.eq.s32.totalorder %s828_s24, 1 }
   0xa   : > { %s1147_s28 = scalar_select %p134_p1, %s1074_s22, %s136_s26  }
   0xb   : > { %p1149_p5 = por %p147_p2, %p146_p0  ;;  %p1153_p6 = por %p153_p4, %p152_p3 }
   0xc   : > { %p831_p7 = scmp.ge.s32.totalorder %s1078_s23, 1  ;;  %p192_p8 = scmp.lt.s32.totalorder %s1078_s23, 3 }
   0xe   : > { %p193_p9 = pnand %p831_p7, %p192_p8 }
   0xf   : > { %s1165_s10 = sshll.u32 (!%p193_p9), %s827_s4, 4  ;;  %s533_s6 = sld [smem:[#allocation2]] (!%p193_p9) }
  0x10   : > { %196 = sbr.rel (%p193_p9) target bundleno = 452 (0x1c4), region = 40  ;;  %p220_p10 = scmp.lt.s32.totalorder (!%p193_p9), %s1165_s10, 31 }
  0x11   : > { %s217_s7 = sand.u32 (!%p193_p9), 1, %s1070_s21  }
  0x12   : > { %s218_s8 = scalar_lea.vmem (!%p193_p9), [#allocation3], %s217_s7  ;;  %s761_s14 = scalar_lea.sflag (!%p193_p9), [#allocation4], %s217_s7 }
  0x13   : > { %s773_s9 = sshll.u32 (!%p193_p9), %s218_s8, 4  ;;  %s774_s9 = int_to_ptr.vmem [resolvable:$true] %s773_s9 }
  0x14   : > { %s1018_s15 = scalar_lea.vmem (!%p193_p9), %s774_s9, 16 }
  0x15   : > { %v244_v0 = vld [vmem:[%s1370_s1 + $0x18] sm:$0xff]  ;;  %v243_v1 = vld [vmem:[%s1370_s1 + $0x10] sm:$0xff]  ;;  %v242_v2 = vld [vmem:[%s1370_s1 + $0x8] sm:$0xff]  ;;  %s221_s13 = scalar_select %p220_p10, %s1165_s10, 31  ;;  %vm252_vm0 = vcmask 261120   ;;  %vm658_vm1 = vcmask 130112  }
  0x16   : > { %875 = vmatprep.subr.mxu0 %v244_v0  ;;  %907 = vmatprep.subr.mxu1 %v244_v0  ;;  %v241_v3 = vld [vmem:[%s1370_s1] sm:$0xff]  ;;  %vm665_vm2 = vcmask 195712   ;;  %vm672_vm3 = vcmask 261312   ;;  %vm679_vm4 = vcmask 326912   ;;  %vm686_vm5 = vcmask 392512   ;;  %p1019_p11 = scmp.ne.s32.totalorder %s774_s9, %s1018_s15 }
  0x17   : > { %876 = vmatpush3.msra.mxu0 %v244_v0  ;;  %911 = vmatpush3.msra.mxu1 %v244_v0  ;;  %s833_s16 = sshll.u32 %s221_s13, 3  ;;  %v1215_v20 = vld [vmem:[%s1371_s2] ss:$0 sm:$0xff]  ;;  %vm693_vm6 = vcmask 458112   ;;  %vm700_vm7 = vcmask 523712   ;;  %vm707_vm8 = vcmask 589312   ;;  %s1332_s13 = scalar_lea.hbm %s1374_s5, %s1165_s10 }
  0x18   : > { %877 = vmatprep.subr.mxu0 %v243_v1  ;;  %908 = vmatprep.subr.mxu1 %v243_v1  ;;  %s1178_s19 = scalar_lea.vmem %s1369_s0, %s833_s16  ;;  %v1224_v31 = vld [vmem:[%s1372_s3] ss:$0 sm:$0xff]  ;;  %vm714_vm9 = vcmask 654912   ;;  %vm721_vm10 = vcmask 720512   ;;  %vm728_vm11 = vcmask 786112   ;;  %vm735_vm12 = vcmask 851712   ;;  %p1020_p12 = pnand %p1019_p11, %p1149_p5 }
  0x19   : > { %878 = vmatpush3.msra.mxu0 %v243_v1  ;;  %912 = vmatpush3.msra.mxu1 %v243_v1  ;;  %v225_v4 = vld [vmem:[%s1178_s19] sm:$0xff]  ;;  %v226_v6 = vld [vmem:[%s1178_s19 + $0x8] sm:$0xff]  ;;  %v227_v8 = vld [vmem:[%s1178_s19 + $0x10] sm:$0xff]  ;;  %vm742_vm13 = vcmask 917312   ;;  %vm749_vm14 = vcmask 982912   ;;  %vm756_vm15 = vcmask 1048512  }
  0x1a   : > { %879 = vmatprep.subr.mxu0 %v242_v2  ;;  %909 = vmatprep.subr.mxu1 %v242_v2  ;;  %v233_v5 = vld [vmem:[%s1178_s19 + $0x40] sm:$0xff]  ;;  %v234_v7 = vld [vmem:[%s1178_s19 + $0x48] sm:$0xff]  ;;  %v235_v9 = vld [vmem:[%s1178_s19 + $0x50] sm:$0xff]  ;;  %p1021_p13 = pneg %p1020_p12  ;;  %s1080_s16 = smov [#allocation3]  }
  0x1b   : > { %880 = vmatpush3.msra.mxu0 %v242_v2  ;;  %913 = vmatpush3.msra.mxu1 %v242_v2  ;;  %v228_v10 = vld [vmem:[%s1178_s19 + $0x18] sm:$0xff]  ;;  %v229_v12 = vld [vmem:[%s1178_s19 + $0x20] sm:$0xff]  ;;  %v230_v14 = vld [vmem:[%s1178_s19 + $0x28] sm:$0xff]  ;;  %s1022_s17 = sshll.u32 %s1080_s16, 4  ;;  %s1023_s17 = int_to_ptr.vmem [resolvable:$false] %s1022_s17 }
  0x1c   : > { %881 = vmatprep.subr.mxu0 %v241_v3  ;;  %910 = vmatprep.subr.mxu1 %v241_v3  ;;  %v236_v11 = vld [vmem:[%s1178_s19 + $0x58] sm:$0xff]  ;;  %v237_v13 = vld [vmem:[%s1178_s19 + $0x60] sm:$0xff]  ;;  %v238_v15 = vld [vmem:[%s1178_s19 + $0x68] sm:$0xff]  ;;  %s1024_s18 = scalar_lea.vmem %s1023_s17, 32  ;;  %p1025_p0 = scmp.lt.s32.totalorder %s774_s9, %s1023_s17 }
  0x1d   : > { %882 = vmatpush3.msra.mxu0 %v241_v3  ;;  %914 = vmatpush3.msra.mxu1 %v241_v3  ;;  %v231_v16 = vld [vmem:[%s1178_s19 + $0x30] sm:$0xff]  ;;  %v232_v18 = vld [vmem:[%s1178_s19 + $0x38] sm:$0xff]  ;;  %p1026_p1 = scmp.lt.s32.totalorder %s1024_s18, %s1018_s15 }
  0x1e   : > { %883 = vmatprep.mubr.msk.f32.mxu0 %vm252_vm0, %v225_v4  ;;  %895 = vmatprep.mubr.msk.f32.mxu1 %vm252_vm0, %v233_v5  ;;  %v239_v17 = vld [vmem:[%s1178_s19 + $0x70] sm:$0xff]  ;;  %v240_v19 = vld [vmem:[%s1178_s19 + $0x78] sm:$0xff] }
  0x1f   : > { %884 = vmatmul.mubr.msk.f32.vlgmr.msra.gmra.mxu0 %vm252_vm0, %v226_v6  ;;  %896 = vmatmul.mubr.msk.f32.vlgmr.msra.gmra.mxu1 %vm252_vm0, %v234_v7  ;;  %p1027_p2 = por %p1026_p1, %p1025_p0 }
  0x20   : > { %886 = vmatprep.mubr.msk.f32.mxu0 %vm252_vm0, %v227_v8  ;;  %898 = vmatprep.mubr.msk.f32.mxu1 %vm252_vm0, %v235_v9 }
  0x21   : > { %p1028_p3 = pnand %p1027_p2, %p1021_p13 }
  0x23   : > { %887 = vmatmul.mubr.msk.f32.gmra.mxu0 %vm252_vm0, %v228_v10  ;;  %899 = vmatmul.mubr.msk.f32.gmra.mxu1 %vm252_vm0, %v236_v11 }
  0x24   : > { %889 = vmatprep.mubr.msk.f32.mxu0 %vm252_vm0, %v229_v12  ;;  %901 = vmatprep.mubr.msk.f32.mxu1 %vm252_vm0, %v237_v13 }
  0x27   : > { %890 = vmatmul.mubr.msk.f32.gmra.mxu0 %vm252_vm0, %v230_v14  ;;  %902 = vmatmul.mubr.msk.f32.gmra.mxu1 %vm252_vm0, %v238_v15 }
  0x28   : > { %892 = vmatprep.mubr.msk.f32.mxu0 %vm252_vm0, %v231_v16  ;;  %904 = vmatprep.mubr.msk.f32.mxu1 %vm252_vm0, %v239_v17 }
  0x2b   : > { %893 = vmatmul.mubr.msk.f32.gmra.mxu0 %vm252_vm0, %v232_v18  ;;  %905 = vmatmul.mubr.msk.f32.gmra.mxu1 %vm252_vm0, %v240_v19 }
  0xdf   : > { %v885_v21 = vpop.f32.mrf.mxu0  ;;  %v897_v22 = vpop.f32.mrf.mxu1 }
  0xe0   : > { %v373_v23 = vadd.f32 %v885_v21, %v1215_v20  ;;  %v413_v24 = vadd.f32 %v897_v22, %v1215_v20 }
  0xe1   : > { %v367_v25 = vpop.f32.mrf.mxu0  ;;  %v407_v26 = vpop.f32.mrf.mxu1 }
  0xe2   : > { %v447_v27 = vmax.f32 %v373_v23, 0.0  ;;  %v455_v28 = vmax.f32 %v413_v24, 0.0  ;;  %v368_v29 = vadd.f32 %v1215_v20, %v367_v25  ;;  %v408_v30 = vadd.f32 %v1215_v20, %v407_v26 }
  0xe3   : > { %v888_v32 = vpop.f32.mrf.mxu0  ;;  %v900_v33 = vpop.f32.mrf.mxu1 }
  0xe4   : > { %v446_v34 = vmax.f32 %v368_v29, 0.0  ;;  %v383_v35 = vadd.f32 %v888_v32, %v1215_v20  ;;  %v423_v36 = vadd.f32 %v900_v33, %v1215_v20  ;;  %v478_v38 = vmul.f32 %v1224_v31, %v455_v28 }
  0xe5   : > { %v377_v37 = vpop.f32.mrf.mxu0  ;;  %v470_v39 = vmul.f32 %v1224_v31, %v447_v27  ;;  %v417_v40 = vpop.f32.mrf.mxu1  ;;  %v454_v41 = vmax.f32 %v408_v30, 0.0 }
  0xe6   : > { %v449_v42 = vmax.f32 %v383_v35, 0.0  ;;  %v378_v43 = vadd.f32 %v1215_v20, %v377_v37  ;;  %v457_v44 = vmax.f32 %v423_v36, 0.0  ;;  %v512_v45 = vsel %vm252_vm0, %v478_v38, 0.0 }
  0xe7   : > { %v488_v46 = vsel %vm252_vm0, %v470_v39, 0.0  ;;  %v418_v47 = vadd.f32 %v1215_v20, %v417_v40  ;;  %v891_v48 = vpop.f32.mrf.mxu0  ;;  %v469_v49 = vmul.f32 %v1224_v31, %v446_v34  ;;  %513 = vadd.xlane.f32.xlu1 %v512_v45  ;;  %v903_v51 = vpop.f32.mrf.mxu1  ;;  %v477_v57 = vmul.f32 %v1224_v31, %v454_v41 }
  0xe8   : > { %489 = vadd.xlane.f32.xlu0 %v488_v46  ;;  %v472_v50 = vmul.f32 %v1224_v31, %v449_v42  ;;  %v480_v53 = vmul.f32 %v1224_v31, %v457_v44  ;;  %v448_v54 = vmax.f32 %v378_v43, 0.0  ;;  %v393_v56 = vadd.f32 %v891_v48, %v1215_v20 }
  0xe9   : > { %v387_v52 = vpop.f32.mrf.mxu0  ;;  %v456_v58 = vmax.f32 %v418_v47, 0.0  ;;  %v485_v59 = vsel %vm252_vm0, %v469_v49, 0.0  ;;  %v427_v62 = vpop.f32.mrf.mxu1  ;;  %v509_v2 = vsel %vm252_vm0, %v477_v57, 0.0  ;;  %v433_v9 = vadd.f32 %v903_v51, %v1215_v20 }
  0xea   : > { %v494_v55 = vsel %vm252_vm0, %v472_v50, 0.0  ;;  %v388_v60 = vadd.f32 %v1215_v20, %v387_v52  ;;  %v518_v63 = vsel %vm252_vm0, %v480_v53, 0.0  ;;  %v451_v1 = vmax.f32 %v393_v56, 0.0 }
  0xeb   : > { %v894_v61 = vpop.f32.mrf.mxu0  ;;  %495 = vadd.xlane.f32.xlu1 %v494_v55  ;;  %v471_v3 = vmul.f32 %v1224_v31, %v448_v54  ;;  %v479_v7 = vmul.f32 %v1224_v31, %v456_v58  ;;  %v906_v8 = vpop.f32.mrf.mxu1  ;;  %v428_v11 = vadd.f32 %v1215_v20, %v427_v62  ;;  %v459_v18 = vmax.f32 %v433_v9, 0.0 }
  0xec   : > { %486 = vadd.xlane.f32.xlu0 %v485_v59  ;;  %v450_v4 = vmax.f32 %v388_v60, 0.0  ;;  %v403_v5 = vadd.f32 %v894_v61, %v1215_v20  ;;  %v474_v12 = vmul.f32 %v1224_v31, %v451_v1  ;;  %v443_v21 = vadd.f32 %v906_v8, %v1215_v20 }
  0xed   : > { %v397_v0 = vpop.f32.mrf.mxu0  ;;  %v491_v10 = vsel %vm252_vm0, %v471_v3, 0.0  ;;  %v515_v15 = vsel %vm252_vm0, %v479_v7, 0.0  ;;  %v437_v17 = vpop.f32.mrf.mxu1  ;;  %v458_v19 = vmax.f32 %v428_v11, 0.0  ;;  %v482_v28 = vmul.f32 %v1224_v31, %v459_v18 }
  0xee   : > { %v398_v6 = vadd.f32 %v1215_v20, %v397_v0  ;;  %v453_v13 = vmax.f32 %v403_v5, 0.0  ;;  %v473_v16 = vmul.f32 %v1224_v31, %v450_v4  ;;  %v500_v22 = vsel %vm252_vm0, %v474_v12, 0.0 }
  0xef   : > { %519 = vadd.xlane.f32.xlu1 %v518_v63  ;;  %v438_v24 = vadd.f32 %v1215_v20, %v437_v17  ;;  %v461_v27 = vmax.f32 %v443_v21, 0.0  ;;  %v481_v33 = vmul.f32 %v1224_v31, %v458_v19  ;;  %v524_v20 = vsel %vm252_vm0, %v482_v28, 0.0 }
  0xf0   : > { %510 = vadd.xlane.f32.xlu0 %v509_v2  ;;  %v452_v14 = vmax.f32 %v398_v6, 0.0  ;;  %v497_v23 = vsel %vm252_vm0, %v473_v16, 0.0  ;;  %v476_v25 = vmul.f32 %v1224_v31, %v453_v13  ;;  %v1270_v39 = vstv %s533_s6 }
  0xf1   : > { %v460_v29 = vmax.f32 %v438_v24, 0.0  ;;  %v521_v34 = vsel %vm252_vm0, %v481_v33, 0.0  ;;  %v484_v35 = vmul.f32 %v1224_v31, %v461_v27 }
  0xf2   : > { %v475_v26 = vmul.f32 %v1224_v31, %v452_v14  ;;  %v506_v30 = vsel %vm252_vm0, %v476_v25, 0.0 }
  0xf3   : > { %492 = vadd.xlane.f32.xlu1 %v491_v10  ;;  %v483_v36 = vmul.f32 %v1224_v31, %v460_v29  ;;  %v530_v37 = vsel %vm252_vm0, %v484_v35, 0.0 }
  0xf4   : > { %516 = vadd.xlane.f32.xlu0 %v515_v15  ;;  %v503_v32 = vsel %vm252_vm0, %v475_v26, 0.0 }
  0xf5   : > { %v527_v38 = vsel %vm252_vm0, %v483_v36, 0.0 }
  0xf7   : > { %501 = vadd.xlane.f32.xlu1 %v500_v22 }
  0xf8   : > { %498 = vadd.xlane.f32.xlu0 %v497_v23 }
  0xfb   : > { %507 = vadd.xlane.f32.xlu1 %v506_v30 }
  0xfc   : > { %504 = vadd.xlane.f32.xlu0 %v503_v32 }
  0xff   : > { %525 = vadd.xlane.f32.xlu1 %v524_v20 }
 0x100   : > { %522 = vadd.xlane.f32.xlu0 %v521_v34 }
 0x103   : > { %531 = vadd.xlane.f32.xlu1 %v530_v37 }
 0x104   : > { %528 = vadd.xlane.f32.xlu0 %v527_v38 }
 0x170   : > { %v514_v40 = vpop.xlane.xlu1 %513 }
 0x171   : > { %v490_v41 = vpop.xlane.xlu0 %489  ;;  %v544_v52 = vadd.f32 %v1270_v39, %v514_v40 }
 0x172   : > { %v536_v42 = vadd.f32 %v1270_v39, %v490_v41 }
 0x173   : > { %v560_v58 = vsub.f32 0.0, %v544_v52 }
 0x174   : > { %v552_v43 = vsub.f32 0.0, %v536_v42  ;;  %v496_v44 = vpop.xlane.xlu1 %495 }
 0x175   : > { %v487_v45 = vpop.xlane.xlu0 %486  ;;  %v538_v46 = vadd.f32 %v1270_v39, %v496_v44  ;;  %v585_v5 = vmul.f32 1.442695, %v560_v58 }
 0x176   : > { %v535_v31 = vadd.f32 %v1270_v39, %v487_v45  ;;  %v569_v47 = vmul.f32 1.442695, %v552_v43 }
 0x177   : > { %v554_v53 = vsub.f32 0.0, %v538_v46 }
 0x178   : > { %v551_v48 = vsub.f32 0.0, %v535_v31  ;;  %v520_v49 = vpop.xlane.xlu1 %519  ;;  %954 = vpow2.f32 %v569_v47  ;;  %v647_v47 = vlaneseq }
 0x179   : > { %v511_v50 = vpop.xlane.xlu0 %510  ;;  %v573_v59 = vmul.f32 1.442695, %v554_v53  ;;  %v546_v60 = vadd.f32 %v1270_v39, %v520_v49 }
 0x17a   : > { %v567_v51 = vmul.f32 1.442695, %v551_v48  ;;  %v543_v54 = vadd.f32 %v1270_v39, %v511_v50  ;;  %v1288_v52 = vand.u32 127, %v647_v47 }
 0x17b   : > { %v562_v6 = vsub.f32 0.0, %v546_v60 }
 0x17c   : > { %956 = vpow2.f32 %v567_v51  ;;  %v493_v55 = vpop.xlane.xlu1 %492  ;;  %v559_v62 = vsub.f32 0.0, %v543_v54 }
 0x17d   : > { %v517_v56 = vpop.xlane.xlu0 %516  ;;  %v537_v57 = vadd.f32 %v1270_v39, %v493_v55  ;;  %958 = vpow2.f32 %v573_v59  ;;  %v589_v17 = vmul.f32 1.442695, %v562_v6  ;;  %v660_v59 = vadd.s32 4294967280, %v1288_v52 }
 0x17e   : > { %v545_v63 = vadd.f32 %v1270_v39, %v517_v56  ;;  %v583_v9 = vmul.f32 1.442695, %v559_v62 }
 0x17f   : > { %v553_v61 = vsub.f32 0.0, %v537_v57 }
 0x180   : > { %v502_v0 = vpop.xlane.xlu1 %501  ;;  %v561_v10 = vsub.f32 0.0, %v545_v63  ;;  %v653_v63 = vadd.s32 4294967288, %v1288_v52 }
 0x181   : > { %v499_v1 = vpop.xlane.xlu0 %498  ;;  %v571_v2 = vmul.f32 1.442695, %v553_v61  ;;  %v540_v3 = vadd.f32 %v1270_v39, %v502_v0  ;;  %v1291_v61 = vshrl.u32 %v647_v47, 7 }
 0x182   : > { %v539_v4 = vadd.f32 %v1270_v39, %v499_v1  ;;  %v587_v21 = vmul.f32 1.442695, %v561_v10 }
 0x183   : > { %960 = vpow2.f32 %v571_v2  ;;  %v556_v7 = vsub.f32 0.0, %v540_v3  ;;  %v651_v6 = vsub.s32 %v1288_v52, %v1291_v61 }
 0x184   : > { %v555_v8 = vsub.f32 0.0, %v539_v4  ;;  %v508_v11 = vpop.xlane.xlu1 %507  ;;  %962 = vpow2.f32 %v585_v5  ;;  %v667_v5 = vadd.s32 4294967272, %v1288_v52 }
 0x185   : > { %v505_v12 = vpop.xlane.xlu0 %504  ;;  %v577_v13 = vmul.f32 1.442695, %v556_v7  ;;  %v542_v14 = vadd.f32 %v1270_v39, %v508_v11  ;;  %v955_v19 = vpop.eup %954  ;;  %964 = vpow2.f32 %v583_v9  ;;  %v663_v9 = vsub.s32 %v660_v59, %v1291_v61 }
 0x186   : > { %v575_v15 = vmul.f32 1.442695, %v555_v8  ;;  %v541_v16 = vadd.f32 %v1270_v39, %v505_v12  ;;  %v600_v30 = vadd.f32 1.0, %v955_v19  ;;  %v656_v11 = vsub.s32 %v653_v63, %v1291_v61 }
 0x187   : > { %v558_v18 = vsub.f32 0.0, %v542_v14  ;;  %966 = vpow2.f32 %v577_v13  ;;  %v674_v14 = vadd.s32 4294967264, %v1288_v52 }
 0x188   : > { %v557_v22 = vsub.f32 0.0, %v541_v16  ;;  %v526_v23 = vpop.xlane.xlu1 %525  ;;  %968 = vpow2.f32 %v575_v15  ;;  %v670_v16 = vsub.s32 %v667_v5, %v1291_v61 }
 0x189   : > { %v523_v24 = vpop.xlane.xlu0 %522  ;;  %v957_v25 = vpop.eup %956  ;;  %v581_v26 = vmul.f32 1.442695, %v558_v18  ;;  %v548_v27 = vadd.f32 %v1270_v39, %v526_v23  ;;  %970 = vpow2.f32 %v589_v17  ;;  %v681_v18 = vadd.s32 4294967256, %v1288_v52 }
 0x18a   : > { %v579_v28 = vmul.f32 1.442695, %v557_v22  ;;  %v547_v29 = vadd.f32 %v1270_v39, %v523_v24  ;;  %v599_v33 = vadd.f32 1.0, %v957_v25  ;;  %972 = vpow2.f32 %v587_v21  ;;  %v959_v41 = vpop.eup %958 }
 0x18b   : > { %v564_v32 = vsub.f32 0.0, %v548_v27  ;;  %974 = vpow2.f32 %v581_v26  ;;  %v602_v48 = vadd.f32 1.0, %v959_v41  ;;  %v695_v24 = vadd.s32 4294967240, %v1288_v52 }
 0x18c   : > { %v563_v20 = vsub.f32 0.0, %v547_v29  ;;  %v532_v34 = vpop.xlane.xlu1 %531  ;;  %976 = vpow2.f32 %v579_v28  ;;  %v677_v27 = vsub.s32 %v674_v14, %v1291_v61  ;;  %v688_v28 = vadd.s32 4294967248, %v1288_v52 }
 0x18d   : > { %v529_v35 = vpop.xlane.xlu0 %528  ;;  %v593_v36 = vmul.f32 1.442695, %v564_v32  ;;  %v550_v37 = vadd.f32 %v1270_v39, %v532_v34  ;;  %978 = vrcp.f32 %v600_v30  ;;  %v684_v32 = vsub.s32 %v681_v18, %v1291_v61 }
 0x18e   : > { %v591_v38 = vmul.f32 1.442695, %v563_v20  ;;  %v549_v40 = vadd.f32 %v1270_v39, %v529_v35  ;;  %980 = vrcp.f32 %v599_v33  ;;  %v702_v20 = vadd.s32 4294967232, %v1288_v52 }
 0x18f   : > { %v566_v42 = vsub.f32 0.0, %v550_v37  ;;  %982 = vpow2.f32 %v593_v36  ;;  %v709_v36 = vadd.s32 4294967224, %v1288_v52 }
 0x190   : > { %v961_v43 = vpop.eup %960  ;;  %v565_v44 = vsub.f32 0.0, %v549_v40  ;;  %984 = vpow2.f32 %v591_v38  ;;  %v698_v38 = vsub.s32 %v695_v24, %v1291_v61  ;;  %v716_v40 = vadd.s32 4294967216, %v1288_v52 }
 0x191   : > { %v601_v45 = vadd.f32 1.0, %v961_v43  ;;  %v597_v31 = vmul.f32 1.442695, %v566_v42  ;;  %v963_v49 = vpop.eup %962  ;;  %v691_v42 = vsub.s32 %v688_v28, %v1291_v61 }
 0x192   : > { %v595_v46 = vmul.f32 1.442695, %v565_v44  ;;  %v965_v50 = vpop.eup %964  ;;  %v608_v62 = vadd.f32 1.0, %v963_v49 }
 0x193   : > { %986 = vrcp.f32 %v601_v45  ;;  %v607_v55 = vadd.f32 1.0, %v965_v50  ;;  %v737_v50 = vadd.s32 4294967192, %v1288_v52 }
 0x194   : > { %988 = vpow2.f32 %v597_v31  ;;  %v967_v51 = vpop.eup %966  ;;  %v723_v31 = vadd.s32 4294967208, %v1288_v52 }
 0x195   : > { %990 = vpow2.f32 %v595_v46  ;;  %v969_v39 = vpop.eup %968  ;;  %v604_v53 = vadd.f32 1.0, %v967_v51  ;;  %v730_v46 = vadd.s32 4294967200, %v1288_v52 }
 0x196   : > { %992 = vrcp.f32 %v602_v48  ;;  %v971_v54 = vpop.eup %970  ;;  %v603_v56 = vadd.f32 1.0, %v969_v39  ;;  %v705_v48 = vsub.s32 %v702_v20, %v1291_v61  ;;  %v712_v39 = vsub.s32 %v709_v36, %v1291_v61 }
 0x197   : > { %v973_v57 = vpop.eup %972  ;;  %994 = vrcp.f32 %v604_v53  ;;  %v610_v7 = vadd.f32 1.0, %v971_v54  ;;  %v751_v54 = vadd.s32 4294967176, %v1288_v52  ;;  %v733_v63 = vsub.s32 %v730_v46, %v1291_v61 }
 0x198   : > { %v975_v58 = vpop.eup %974  ;;  %996 = vrcp.f32 %v603_v56  ;;  %v609_v2 = vadd.f32 1.0, %v973_v57  ;;  %v719_v56 = vsub.s32 %v716_v40, %v1291_v61 }
 0x199   : > { %v977_v60 = vpop.eup %976  ;;  %v606_v0 = vadd.f32 1.0, %v975_v58  ;;  %998 = vrcp.f32 %v607_v55  ;;  %v744_v58 = vadd.s32 4294967184, %v1288_v52  ;;  %v754_v52 = vsub.s32 %v751_v54, %v1291_v61 }
 0x19a   : > { %v979_v1 = vpop.eup %978  ;;  %v605_v3 = vadd.f32 1.0, %v977_v60 }
 0x19b   : > { %v981_v4 = vpop.eup %980  ;;  %1000 = vrcp.f32 %v606_v0  ;;  %v657_v23 = vrot.slane %v979_v1, %v656_v11 }
 0x19c   : > { %v983_v8 = vpop.eup %982  ;;  %1002 = vrcp.f32 %v605_v3  ;;  %v652_v17 = vrot.slane %v981_v4, %v651_v6  ;;  %v740_v3 = vsub.s32 %v737_v50, %v1291_v61 }
 0x19d   : > { %v985_v10 = vpop.eup %984  ;;  %1004 = vrcp.f32 %v608_v62  ;;  %v612_v12 = vadd.f32 1.0, %v983_v8  ;;  %v726_v62 = vsub.s32 %v723_v31, %v1291_v61 }
 0x19e   : > { %1006 = vrcp.f32 %v609_v2  ;;  %v611_v15 = vadd.f32 1.0, %v985_v10  ;;  %v659_v30 = vsel %vm658_vm1, %v657_v23, %v652_v17  ;;  %v747_v10 = vsub.s32 %v744_v58, %v1291_v61 }
 0x19f   : > { %1008 = vrcp.f32 %v610_v7 }
 0x1a0   : > { %v987_v13 = vpop.eup %986  ;;  %1010 = vrcp.f32 %v611_v15 }
 0x1a1   : > { %v989_v19 = vpop.eup %988  ;;  %v664_v21 = vrot.slane %v987_v13, %v663_v9  ;;  %1012 = vrcp.f32 %v612_v12 }
 0x1a2   : > { %v991_v22 = vpop.eup %990  ;;  %v614_v25 = vadd.f32 1.0, %v989_v19 }
 0x1a3   : > { %v993_v26 = vpop.eup %992  ;;  %v613_v29 = vadd.f32 1.0, %v991_v22  ;;  %v666_v34 = vsel %vm665_vm2, %v664_v21, %v659_v30 }
 0x1a4   : > { %1014 = vrcp.f32 %v614_v25  ;;  %v995_v33 = vpop.eup %994  ;;  %v671_v37 = vrot.slane %v993_v26, %v670_v16 }
 0x1a5   : > { %1016 = vrcp.f32 %v613_v29  ;;  %v997_v35 = vpop.eup %996  ;;  %v685_v44 = vrot.slane %v995_v33, %v684_v32 }
 0x1a6   : > { %v678_v41 = vrot.slane %v997_v35, %v677_v27  ;;  %v999_v43 = vpop.eup %998  ;;  %v673_v45 = vsel %vm672_vm3, %v671_v37, %v666_v34 }
 0x1a7   : > { %v706_v1 = vrot.slane %v999_v43, %v705_v48 }
 0x1a8   : > { %v1001_v47 = vpop.eup %1000  ;;  %v680_v49 = vsel %vm679_vm4, %v678_v41, %v673_v45 }
 0x1a9   : > { %v1003_v51 = vpop.eup %1002  ;;  %v699_v53 = vrot.slane %v1001_v47, %v698_v38  ;;  %v687_v60 = vsel %vm686_vm5, %v685_v44, %v680_v49 }
 0x1aa   : > { %v1005_v55 = vpop.eup %1004  ;;  %v692_v57 = vrot.slane %v1003_v51, %v691_v42 }
 0x1ab   : > { %v1007_v59 = vpop.eup %1006  ;;  %v713_v5 = vrot.slane %v1005_v55, %v712_v39 }
 0x1ac   : > { %v1009_v0 = vpop.eup %1008  ;;  %v694_v2 = vsel %vm693_vm6, %v692_v57, %v687_v60  ;;  %v720_v8 = vrot.slane %v1007_v59, %v719_v56 }
 0x1ad   : > { %v1011_v4 = vpop.eup %1010  ;;  %v701_v6 = vsel %vm700_vm7, %v699_v53, %v694_v2  ;;  %v727_v12 = vrot.slane %v1009_v0, %v726_v62 }
 0x1ae   : > { %v1013_v7 = vpop.eup %1012  ;;  %v708_v9 = vsel %vm707_vm8, %v706_v1, %v701_v6  ;;  %v734_v15 = vrot.slane %v1011_v4, %v733_v63 }
 0x1af   : > { %v715_v11 = vsel %vm714_vm9, %v713_v5, %v708_v9  ;;  %v741_v18 = vrot.slane %v1013_v7, %v740_v3 }
 0x1b0   : > { %v722_v14 = vsel %vm721_vm10, %v720_v8, %v715_v11 }
 0x1b1   : > { %v1015_v13 = vpop.eup %1014  ;;  %v729_v17 = vsel %vm728_vm11, %v727_v12, %v722_v14 }
 0x1b2   : > { %v1017_v16 = vpop.eup %1016  ;;  %v755_v19 = vrot.slane %v1015_v13, %v754_v52  ;;  %v736_v21 = vsel %vm735_vm12, %v734_v15, %v729_v17 }
 0x1b3   : > { %v748_v61 = vrot.slane %v1017_v16, %v747_v10  ;;  %v743_v22 = vsel %vm742_vm13, %v741_v18, %v736_v21 }
 0x1b5   : > { %v750_v23 = vsel %vm749_vm14, %v748_v61, %v743_v22 }
 0x1b6   : > { %v757_v24 = vsel %vm756_vm15, %v755_v19, %v750_v23 }
 0x1b7   : > { %759 = vst [vmem:[%s218_s8] sm:$0x1] %v757_v24 }
 0x1b8   : > { %1031 = shalt.err (!%p1028_p3)
}
 0x1b9   : > { %s1032_s10 = scalar_lea.hbm %s1332_s13, 16  ;;  %s1036_s24 = scalar_lea.hbm %s1374_s5, 32 }
 0x1ba   : > { %p1033_p4 = scmp.ne.s32.totalorder %s1332_s13, %s1032_s10  ;;  %p1037_p9 = scmp.lt.s32.totalorder %s1332_s13, %s1374_s5 }
 0x1bb   : > { %p1038_p10 = scmp.lt.s32.totalorder %s1036_s24, %s1032_s10 }
 0x1bc   : > { %p1034_p7 = pnand %p1033_p4, %p1149_p5 }
 0x1bd   : > { %p1039_p11 = por %p1038_p10, %p1037_p9 }
 0x1be   : > { %p1035_p8 = pneg %p1034_p7 }
 0x1c0   : > { %p1040_p12 = pnand %p1039_p11, %p1035_p8 }
 0x1c2   : > { %1043 = shalt.err (!%p1040_p12)
}
 0x1c3   : > { %915 = dma.vmem_to_hbm [thread:$0]  (%p1149_p5), %s774_s9, 16, %s1332_s13, %s761_s14  }
 0x1c4 PF: > { %p921_p13 = scmp.ge.s32.totalorder %s1078_s23, 2  ;;  %s785_s6 = sand.u32 1, %s1066_s20  }
 0x1c5   : > { %s786_s7 = scalar_lea.sflag [#allocation4], %s785_s6 }
 0x1c6   : > { %p918_p0 = pnand %p921_p13, %p1153_p6 }
 0x1c8   : > { %p919_p1 = pneg %p918_p0 }
 0x1ca   : > { %1061 = dma.done.wait (%p919_p1), %s786_s7, 16  }
 0x1cb   : > { %1063 = vsyncadd (%p919_p1), %s786_s7, 4294967280  ;;  %p16_p2 = scmp.ge.s32.totalorder %s1137_s25, 4   ;;  %s1377_s20 = smov %s1070_s21 }
 0x1cc   : > { %s1378_s21 = smov %s1074_s22  ;;  %s1379_s22 = smov %s1147_s28 }
 0x1cd   : > { %s1380_s23 = smov %s1137_s25  ;;  %18 = sbr.rel (!%p16_p2) target bundleno = 5 (0x5), region = 75 }
 0x1d2   :  { %790 = vsyncpa [#allocation4], 1 }
 0x1d3   :  { %792 = vsyncpa [#allocation4 + $0x1], 1 }

</bundles_post_ra>
